<compile_context>
chip_gen: v7x
topology: tpu7x:2x2x1
jax: 0.10.0
libtpu: 0.0.40
codegen_flags: <defaults>
</compile_context>

<pallas_src>
import math
import functools

import jax
import jax.numpy as jnp
from jax.experimental import pallas as pl
from jax.experimental.pallas import tpu as pltpu

# ----------------------------- configuration --------------------------------
B = 2            # batch
C_IN = 16        # block input/output channels
C_H = 32         # block hidden channels
T = 16           # time steps
K = 3            # conv kernel size
PAD = (K - 1) // 2
EPS = 1e-5       # BatchNorm1d eps
LRELU_SLOPE = 0.01
# TODO(synk): subsample > 1 branch (strided conv + F.avg_pool1d on the residual) not implemented.
# TODO(synk): BatchNorm1d eval-mode (running statistics) not implemented; training-mode batch stats only.
# TODO(synk): single-TensorCore kernel; on v7x a grid over time/blocks would be needed to use both TCs.


# ------------------------------ fused Pallas kernel ---------------------------
def _im2col_taps(src_ref, c, kk, pad, t, n):
    """Build the (kk*c, n) im2col slab from a zero-padded (>=c, n+2*pad) ref.

    Lane index n encodes (batch = n // t, time = n % t).  The zero pad columns
    provide the 'same'-conv zeros at the global edges; taps that would bleed
    across a batch boundary are masked to zero with an iota-based lane mask.
    """
    pos = jax.lax.broadcasted_iota(jnp.int32, (c, n), 1) % t
    blocks = []
    for k in range(kk):
        s = k - pad
        blk = src_ref[0:c, k:k + n]          # == signal[:, n + s] (zeros at global edges)
        if s != 0:
            valid = (pos + s >= 0) & (pos + s <= t - 1)
            blk = jnp.where(valid, blk, 0.0)
        blocks.append(blk)
    return jnp.concatenate(blocks, axis=0)   # (kk*c, n)


def enc_conv_block_kernel(xp_ref, w_ref, p_ref, o_ref, hp_ref, *,
                          c_in, c_h, kk, pad, t, eps, slope):
    """Fused EncConvBlock forward (batch folded into lanes).

    xp_ref: (c_in, n + 2*pad)  zero-padded, batch-folded input signal
    w_ref : (c_h + c_in, kk*c_h) packed weights: w1 in [0:c_h, 0:kk*c_in],
                                                 w2 in [c_h:, :]
    p_ref : (c_h, 3) packed per-channel vectors: gamma | beta | b2 (padded)
    o_ref : (c_in, n) output (residual already added)
    hp_ref: (c_h, n + 2*pad) VMEM scratch holding the zero-padded hidden signal
    """
    n = o_ref.shape[1]                               # B*T

    # ---- packed parameters (2 slabs -> 2 small DMAs) -------------------------
    w1 = w_ref[0:c_h, 0:kk * c_in]                   # (c_h, K*c_in)
    w2 = w_ref[c_h:c_h + c_in, :]                    # (c_in, K*c_h)
    gamma = p_ref[:, 0:1]                            # (c_h, 1)
    beta = p_ref[:, 1:2]                             # (c_h, 1)
    b2 = p_ref[0:c_in, 2:3]                          # (c_in, 1)
    # conv1 bias is dropped entirely: it cancels in training-mode BatchNorm.

    # ---- ConvNorm #1: single MXU matmul over the batch-folded lane axis ------
    col1 = _im2col_taps(xp_ref, c_in, kk, pad, t, n)            # (K*c_in, n)
    h = jnp.dot(w1, col1, preferred_element_type=jnp.float32)   # (c_h, n)

    # ---- BatchNorm1d (training-mode batch stats, single pass) + LeakyReLU ----
    inv_n = 1.0 / float(n)
    mean = jnp.sum(h, axis=1, keepdims=True) * inv_n             # (c_h, 1)
    ex2 = jnp.sum(h * h, axis=1, keepdims=True) * inv_n          # (c_h, 1)
    var = ex2 - mean * mean
    scale = gamma * jax.lax.rsqrt(var + eps)
    shift = beta - mean * scale
    h = h * scale + shift
    h = jnp.where(h >= 0, h, slope * h)                          # LeakyReLU

    # ---- ConvNorm #2: pad h via one small scratch, single MXU matmul ---------
    hp_ref[...] = jnp.zeros_like(hp_ref)
    hp_ref[:, pad:pad + n] = h
    col2 = _im2col_taps(hp_ref, c_h, kk, pad, t, n)              # (K*c_h, n)
    y = jnp.dot(w2, col2, preferred_element_type=jnp.float32) + b2

    # ---- residual add, one lane-dense store -----------------------------------
    o_ref[...] = xp_ref[:, pad:pad + n] + y


def enc_conv_block(params, x):
    b, c_in, t = x.shape
    w_slab = params['w']
    p_slab = params['p']
    c_h = p_slab.shape[0]
    kk = w_slab.shape[1] // c_h
    pad = (kk - 1) // 2
    n = b * t

    # Fold batch into the lane/time axis (layout plumbing) and pre-pad once so
    # the kernel's conv taps are plain static shifted slice loads.
    xf = jnp.transpose(x, (1, 0, 2)).reshape(c_in, n)            # (c_in, B*T)
    xp = jnp.pad(xf, ((0, 0), (pad, pad)))                       # (c_in, B*T + 2)

    kernel = functools.partial(enc_conv_block_kernel, c_in=c_in, c_h=c_h,
                               kk=kk, pad=pad, t=t, eps=EPS, slope=LRELU_SLOPE)
    yf = pl.pallas_call(
        kernel,
        out_shape=jax.ShapeDtypeStruct((c_in, n), jnp.float32),
        scratch_shapes=[pltpu.VMEM((c_h, n + 2 * pad), jnp.float32)],
    )(xp, w_slab, p_slab)

    return jnp.transpose(yf.reshape(c_in, b, t), (1, 0, 2))      # back to (B, C, T)


# ------------------------------ deterministic init ----------------------------
def _xavier(key, cout, cin, k, gain=1.0):
    fan_in, fan_out = cin * k, cout * k
    lim = gain * math.sqrt(6.0 / (fan_in + fan_out))
    return jax.random.uniform(key, (cout, cin, k), jnp.float32, -lim, lim)


def _uniform(key, shape, lim):
    return jax.random.uniform(key, shape, jnp.float32, -lim, lim)


def init_params(key):
    k1, k2, k3, k4 = jax.random.split(key, 4)
    w1_raw = _xavier(k1, C_H, C_IN, K)                 # torch Conv1d layout (O, I, K)
    b1 = _uniform(k2, (C_H,), 1.0 / math.sqrt(C_IN * K))   # kept for reference only (BN cancels it)
    w2_raw = _xavier(k3, C_IN, C_H, K)
    b2 = _uniform(k4, (C_IN,), 1.0 / math.sqrt(C_H * K))

    # kernel-ready flattened layouts: w_flat[o, k*cin + ci] == torch_w[o, ci, k]
    w1_flat = jnp.transpose(w1_raw, (0, 2, 1)).reshape(C_H, K * C_IN)    # (32, 48)
    w2_flat = jnp.transpose(w2_raw, (0, 2, 1)).reshape(C_IN, K * C_H)    # (16, 96)

    assert C_IN <= C_H, "weight-slab packing assumes c_in <= c_h"
    w_slab = jnp.zeros((C_H + C_IN, K * C_H), jnp.float32)
    w_slab = w_slab.at[0:C_H, 0:K * C_IN].set(w1_flat)
    w_slab = w_slab.at[C_H:C_H + C_IN, :].set(w2_flat)

    gamma = jnp.ones((C_H,), jnp.float32)
    beta = jnp.zeros((C_H,), jnp.float32)
    b2_pad = jnp.zeros((C_H,), jnp.float32).at[0:C_IN].set(b2)
    p_slab = jnp.stack([gamma, beta, b2_pad], axis=1)            # (32, 3)

    params = {'w': w_slab, 'p': p_slab}
    raw = (w1_raw, b1, w2_raw, b2)
    return params, raw


# ------------------------------ pure-JAX reference ----------------------------
def reference_forward(raw, x):
    w1, b1, w2, b2 = raw
    dn = ('NCH', 'OIH', 'NCH')

    def conv3(inp, w, b):
        y = jax.lax.conv_general_dilated(inp, w, (1,), [(1, 1)],
                                         dimension_numbers=dn,
                                         precision=jax.lax.Precision.HIGHEST)
        return y + b[None, :, None]

    h = conv3(x, w1, b1)
    mean = jnp.mean(h, axis=(0, 2), keepdims=True)
    var = jnp.mean(jnp.square(h - mean), axis=(0, 2), keepdims=True)
    h = (h - mean) * jax.lax.rsqrt(var + EPS)
    h = jnp.where(h >= 0, h, LRELU_SLOPE * h)
    y = conv3(h, w2, b2)
    return x + y


# ----------------------------------- main -------------------------------------
if __name__ == "__main__":
    key = jax.random.PRNGKey(0)
    kp, kx = jax.random.split(key)
    params, raw = init_params(kp)
    x = jax.random.normal(kx, (B, C_IN, T), jnp.float32)

    fwd = jax.jit(enc_conv_block)
    y = fwd(params, x)
    y = jax.block_until_ready(y)

    assert y.shape == (B, C_IN, T), y.shape
    assert bool(jnp.all(jnp.isfinite(y)))

    y_ref = reference_forward(raw, x)
    err = float(jnp.max(jnp.abs(y - y_ref)))
    assert bool(jnp.allclose(y, y_ref, atol=5e-2, rtol=5e-2)), err

    print("KERNEL_OK")
</pallas_src>

<mosaic_0001>
module attributes {stable_mosaic.version = 11 : i64} {
  func.func @enc_conv_block_kernel(%arg0: memref<16x34xf32, #tpu.memory_space<vmem>>, %arg1: memref<48x96xf32, #tpu.memory_space<vmem>>, %arg2: memref<32x3xf32, #tpu.memory_space<vmem>>, %arg3: memref<16x32xf32, #tpu.memory_space<vmem>>, %arg4: memref<32x34xf32, #tpu.memory_space<vmem>>) attributes {dimension_semantics = [], scalar_prefetch = 0 : i64, scratch_operands = 1 : i64, tpu.core_type = #tpu.core_type<tc>} {
    %c0 = arith.constant 0 : index
    %c0_0 = arith.constant 0 : index
    %0 = vector.load %arg1[%c0, %c0_0] : memref<48x96xf32, #tpu.memory_space<vmem>>, vector<32x48xf32>
    %c32 = arith.constant 32 : index
    %c0_1 = arith.constant 0 : index
    %1 = vector.load %arg1[%c32, %c0_1] : memref<48x96xf32, #tpu.memory_space<vmem>>, vector<16x96xf32>
    %c0_2 = arith.constant 0 : index
    %c0_3 = arith.constant 0 : index
    %2 = vector.load %arg2[%c0_2, %c0_3] : memref<32x3xf32, #tpu.memory_space<vmem>>, vector<32x1xf32>
    %c0_4 = arith.constant 0 : index
    %c1 = arith.constant 1 : index
    %3 = vector.load %arg2[%c0_4, %c1] : memref<32x3xf32, #tpu.memory_space<vmem>>, vector<32x1xf32>
    %c0_5 = arith.constant 0 : index
    %c2 = arith.constant 2 : index
    %4 = vector.load %arg2[%c0_5, %c2] : memref<32x3xf32, #tpu.memory_space<vmem>>, vector<16x1xf32>
    %5 = tpu.iota {dimensions = array<i32: 1>} : vector<16x32xi32>
    %c16_i32 = arith.constant 16 : i32
    %c0_i32 = arith.constant 0 : i32
    %6 = arith.cmpi eq, %c16_i32, %c0_i32 : i32
    %c1_i32 = arith.constant 1 : i32
    %7 = arith.select %6, %c1_i32, %c16_i32 : i32
    %8 = vector.broadcast %7 : i32 to vector<16x32xi32>
    %9 = arith.remsi %5, %8 : vector<16x32xi32>
    %c0_i32_6 = arith.constant 0 : i32
    %10 = vector.broadcast %c0_i32_6 : i32 to vector<16x32xi32>
    %11 = arith.cmpi ne, %9, %10 : vector<16x32xi32>
    %c0_i32_7 = arith.constant 0 : i32
    %12 = vector.broadcast %c0_i32_7 : i32 to vector<16x32xi32>
    %13 = arith.cmpi slt, %9, %12 : vector<16x32xi32>
    %c0_i32_8 = arith.constant 0 : i32
    %14 = arith.cmpi slt, %7, %c0_i32_8 : i32
    %15 = vector.broadcast %14 : i1 to vector<16x32xi1>
    %16 = vector.broadcast %15 : vector<16x32xi1> to vector<16x32xi1>
    %17 = arith.xori %13, %16 : vector<16x32xi1>
    %18 = arith.andi %17, %11 : vector<16x32xi1>
    %19 = vector.broadcast %7 : i32 to vector<16x32xi32>
    %20 = arith.addi %9, %19 : vector<16x32xi32>
    %21 = arith.select %18, %20, %9 : vector<16x32xi1>, vector<16x32xi32>
    %c0_9 = arith.constant 0 : index
    %c0_10 = arith.constant 0 : index
    %22 = vector.load %arg0[%c0_9, %c0_10] : memref<16x34xf32, #tpu.memory_space<vmem>>, vector<16x32xf32>
    %c-1_i32 = arith.constant -1 : i32
    %23 = vector.broadcast %c-1_i32 : i32 to vector<16x32xi32>
    %24 = arith.addi %21, %23 : vector<16x32xi32>
    %c0_i32_11 = arith.constant 0 : i32
    %25 = vector.broadcast %c0_i32_11 : i32 to vector<16x32xi32>
    %26 = arith.cmpi sge, %24, %25 : vector<16x32xi32>
    %c-1_i32_12 = arith.constant -1 : i32
    %27 = vector.broadcast %c-1_i32_12 : i32 to vector<16x32xi32>
    %28 = arith.addi %21, %27 : vector<16x32xi32>
    %c15_i32 = arith.constant 15 : i32
    %29 = vector.broadcast %c15_i32 : i32 to vector<16x32xi32>
    %30 = arith.cmpi sle, %28, %29 : vector<16x32xi32>
    %31 = arith.andi %26, %30 : vector<16x32xi1>
    %cst = arith.constant 0.000000e+00 : f32
    %32 = vector.broadcast %cst : f32 to vector<16x32xf32>
    %33 = arith.select %31, %22, %32 : vector<16x32xi1>, vector<16x32xf32>
    %c0_13 = arith.constant 0 : index
    %c1_14 = arith.constant 1 : index
    %34 = vector.load %arg0[%c0_13, %c1_14] : memref<16x34xf32, #tpu.memory_space<vmem>>, vector<16x32xf32>
    %c0_15 = arith.constant 0 : index
    %c2_16 = arith.constant 2 : index
    %35 = vector.load %arg0[%c0_15, %c2_16] : memref<16x34xf32, #tpu.memory_space<vmem>>, vector<16x32xf32>
    %c1_i32_17 = arith.constant 1 : i32
    %36 = vector.broadcast %c1_i32_17 : i32 to vector<16x32xi32>
    %37 = arith.addi %21, %36 : vector<16x32xi32>
    %c0_i32_18 = arith.constant 0 : i32
    %38 = vector.broadcast %c0_i32_18 : i32 to vector<16x32xi32>
    %39 = arith.cmpi sge, %37, %38 : vector<16x32xi32>
    %c1_i32_19 = arith.constant 1 : i32
    %40 = vector.broadcast %c1_i32_19 : i32 to vector<16x32xi32>
    %41 = arith.addi %21, %40 : vector<16x32xi32>
    %c15_i32_20 = arith.constant 15 : i32
    %42 = vector.broadcast %c15_i32_20 : i32 to vector<16x32xi32>
    %43 = arith.cmpi sle, %41, %42 : vector<16x32xi32>
    %44 = arith.andi %39, %43 : vector<16x32xi1>
    %cst_21 = arith.constant 0.000000e+00 : f32
    %45 = vector.broadcast %cst_21 : f32 to vector<16x32xf32>
    %46 = arith.select %44, %35, %45 : vector<16x32xi1>, vector<16x32xf32>
    %47 = tpu.concatenate %33, %34, %46 in 0 : vector<16x32xf32>, vector<16x32xf32>, vector<16x32xf32> -> vector<48x32xf32>
    %cst_22 = arith.constant dense<0.000000e+00> : vector<32x32xf32>
    %48 = tpu.matmul %0, %47, %cst_22 {dimension_numbers = #tpu.dot_dimension_numbers<[1], [0], [0], [1], [0, 0, 1, 1], [], []>} : vector<32x48xf32>, vector<48x32xf32>, vector<32x32xf32> -> vector<32x32xf32>
    %cst_23 = arith.constant dense<0.000000e+00> : vector<32xf32>
    %49 = vector.multi_reduction <add>, %48, %cst_23 [1] : vector<32x32xf32> to vector<32xf32>
    %50 = vector.shape_cast %49 : vector<32xf32> to vector<32x1xf32>
    %cst_24 = arith.constant 3.125000e-02 : f32
    %51 = vector.broadcast %cst_24 : f32 to vector<32x1xf32>
    %52 = arith.mulf %50, %51 : vector<32x1xf32>
    %53 = arith.mulf %48, %48 : vector<32x32xf32>
    %cst_25 = arith.constant dense<0.000000e+00> : vector<32xf32>
    %54 = vector.multi_reduction <add>, %53, %cst_25 [1] : vector<32x32xf32> to vector<32xf32>
    %55 = vector.shape_cast %54 : vector<32xf32> to vector<32x1xf32>
    %cst_26 = arith.constant 3.125000e-02 : f32
    %56 = vector.broadcast %cst_26 : f32 to vector<32x1xf32>
    %57 = arith.mulf %55, %56 : vector<32x1xf32>
    %58 = arith.mulf %52, %52 : vector<32x1xf32>
    %59 = arith.subf %57, %58 : vector<32x1xf32>
    %cst_27 = arith.constant 9.99999974E-6 : f32
    %60 = vector.broadcast %cst_27 : f32 to vector<32x1xf32>
    %61 = arith.addf %59, %60 : vector<32x1xf32>
    %62 = math.rsqrt %61 : vector<32x1xf32>
    %63 = arith.mulf %2, %62 : vector<32x1xf32>
    %64 = arith.mulf %52, %63 : vector<32x1xf32>
    %65 = arith.subf %3, %64 : vector<32x1xf32>
    %66 = vector.broadcast %63 : vector<32x1xf32> to vector<32x32xf32>
    %67 = arith.mulf %48, %66 : vector<32x32xf32>
    %68 = vector.broadcast %65 : vector<32x1xf32> to vector<32x32xf32>
    %69 = arith.addf %67, %68 : vector<32x32xf32>
    %cst_28 = arith.constant 0.000000e+00 : f32
    %70 = vector.broadcast %cst_28 : f32 to vector<32x32xf32>
    %71 = arith.cmpf oge, %69, %70 : vector<32x32xf32>
    %cst_29 = arith.constant 0.00999999977 : f32
    %72 = vector.broadcast %cst_29 : f32 to vector<32x32xf32>
    %73 = arith.mulf %72, %69 : vector<32x32xf32>
    %74 = arith.select %71, %69, %73 : vector<32x32xi1>, vector<32x32xf32>
    %cst_30 = arith.constant 0.000000e+00 : f32
    %75 = vector.broadcast %cst_30 : f32 to vector<32x34xf32>
    %c0_31 = arith.constant 0 : index
    %c0_32 = arith.constant 0 : index
    %76 = vector.load %arg4[%c0_31, %c0_32] : memref<32x34xf32, #tpu.memory_space<vmem>>, vector<32x34xf32>
    tpu.vector_store %arg4[%c0_31, %c0_32], %75 {strides = array<i32>} : memref<32x34xf32, #tpu.memory_space<vmem>>, vector<32x34xf32>,
    %c0_33 = arith.constant 0 : index
    %c1_34 = arith.constant 1 : index
    %77 = vector.load %arg4[%c0_33, %c1_34] : memref<32x34xf32, #tpu.memory_space<vmem>>, vector<32x32xf32>
    tpu.vector_store %arg4[%c0_33, %c1_34], %74 {strides = array<i32>} : memref<32x34xf32, #tpu.memory_space<vmem>>, vector<32x32xf32>,
    %78 = tpu.iota {dimensions = array<i32: 1>} : vector<32x32xi32>
    %c16_i32_35 = arith.constant 16 : i32
    %c0_i32_36 = arith.constant 0 : i32
    %79 = arith.cmpi eq, %c16_i32_35, %c0_i32_36 : i32
    %c1_i32_37 = arith.constant 1 : i32
    %80 = arith.select %79, %c1_i32_37, %c16_i32_35 : i32
    %81 = vector.broadcast %80 : i32 to vector<32x32xi32>
    %82 = arith.remsi %78, %81 : vector<32x32xi32>
    %c0_i32_38 = arith.constant 0 : i32
    %83 = vector.broadcast %c0_i32_38 : i32 to vector<32x32xi32>
    %84 = arith.cmpi ne, %82, %83 : vector<32x32xi32>
    %c0_i32_39 = arith.constant 0 : i32
    %85 = vector.broadcast %c0_i32_39 : i32 to vector<32x32xi32>
    %86 = arith.cmpi slt, %82, %85 : vector<32x32xi32>
    %c0_i32_40 = arith.constant 0 : i32
    %87 = arith.cmpi slt, %80, %c0_i32_40 : i32
    %88 = vector.broadcast %87 : i1 to vector<32x32xi1>
    %89 = vector.broadcast %88 : vector<32x32xi1> to vector<32x32xi1>
    %90 = arith.xori %86, %89 : vector<32x32xi1>
    %91 = arith.andi %90, %84 : vector<32x32xi1>
    %92 = vector.broadcast %80 : i32 to vector<32x32xi32>
    %93 = arith.addi %82, %92 : vector<32x32xi32>
    %94 = arith.select %91, %93, %82 : vector<32x32xi1>, vector<32x32xi32>
    %c0_41 = arith.constant 0 : index
    %c0_42 = arith.constant 0 : index
    %95 = vector.load %arg4[%c0_41, %c0_42] : memref<32x34xf32, #tpu.memory_space<vmem>>, vector<32x32xf32>
    %c-1_i32_43 = arith.constant -1 : i32
    %96 = vector.broadcast %c-1_i32_43 : i32 to vector<32x32xi32>
    %97 = arith.addi %94, %96 : vector<32x32xi32>
    %c0_i32_44 = arith.constant 0 : i32
    %98 = vector.broadcast %c0_i32_44 : i32 to vector<32x32xi32>
    %99 = arith.cmpi sge, %97, %98 : vector<32x32xi32>
    %c-1_i32_45 = arith.constant -1 : i32
    %100 = vector.broadcast %c-1_i32_45 : i32 to vector<32x32xi32>
    %101 = arith.addi %94, %100 : vector<32x32xi32>
    %c15_i32_46 = arith.constant 15 : i32
    %102 = vector.broadcast %c15_i32_46 : i32 to vector<32x32xi32>
    %103 = arith.cmpi sle, %101, %102 : vector<32x32xi32>
    %104 = arith.andi %99, %103 : vector<32x32xi1>
    %cst_47 = arith.constant 0.000000e+00 : f32
    %105 = vector.broadcast %cst_47 : f32 to vector<32x32xf32>
    %106 = arith.select %104, %95, %105 : vector<32x32xi1>, vector<32x32xf32>
    %c0_48 = arith.constant 0 : index
    %c1_49 = arith.constant 1 : index
    %107 = vector.load %arg4[%c0_48, %c1_49] : memref<32x34xf32, #tpu.memory_space<vmem>>, vector<32x32xf32>
    %c0_50 = arith.constant 0 : index
    %c2_51 = arith.constant 2 : index
    %108 = vector.load %arg4[%c0_50, %c2_51] : memref<32x34xf32, #tpu.memory_space<vmem>>, vector<32x32xf32>
    %c1_i32_52 = arith.constant 1 : i32
    %109 = vector.broadcast %c1_i32_52 : i32 to vector<32x32xi32>
    %110 = arith.addi %94, %109 : vector<32x32xi32>
    %c0_i32_53 = arith.constant 0 : i32
    %111 = vector.broadcast %c0_i32_53 : i32 to vector<32x32xi32>
    %112 = arith.cmpi sge, %110, %111 : vector<32x32xi32>
    %c1_i32_54 = arith.constant 1 : i32
    %113 = vector.broadcast %c1_i32_54 : i32 to vector<32x32xi32>
    %114 = arith.addi %94, %113 : vector<32x32xi32>
    %c15_i32_55 = arith.constant 15 : i32
    %115 = vector.broadcast %c15_i32_55 : i32 to vector<32x32xi32>
    %116 = arith.cmpi sle, %114, %115 : vector<32x32xi32>
    %117 = arith.andi %112, %116 : vector<32x32xi1>
    %cst_56 = arith.constant 0.000000e+00 : f32
    %118 = vector.broadcast %cst_56 : f32 to vector<32x32xf32>
    %119 = arith.select %117, %108, %118 : vector<32x32xi1>, vector<32x32xf32>
    %120 = tpu.concatenate %106, %107, %119 in 0 : vector<32x32xf32>, vector<32x32xf32>, vector<32x32xf32> -> vector<96x32xf32>
    %cst_57 = arith.constant dense<0.000000e+00> : vector<16x32xf32>
    %121 = tpu.matmul %1, %120, %cst_57 {dimension_numbers = #tpu.dot_dimension_numbers<[1], [0], [0], [1], [0, 0, 1, 1], [], []>} : vector<16x96xf32>, vector<96x32xf32>, vector<16x32xf32> -> vector<16x32xf32>
    %122 = vector.broadcast %4 : vector<16x1xf32> to vector<16x32xf32>
    %123 = arith.addf %121, %122 : vector<16x32xf32>
    %c0_58 = arith.constant 0 : index
    %c1_59 = arith.constant 1 : index
    %124 = vector.load %arg0[%c0_58, %c1_59] : memref<16x34xf32, #tpu.memory_space<vmem>>, vector<16x32xf32>
    %125 = arith.addf %124, %123 : vector<16x32xf32>
    %c0_60 = arith.constant 0 : index
    %c0_61 = arith.constant 0 : index
    %126 = vector.load %arg3[%c0_60, %c0_61] : memref<16x32xf32, #tpu.memory_space<vmem>>, vector<16x32xf32>
    tpu.vector_store %arg3[%c0_60, %c0_61], %125 {strides = array<i32>} : memref<16x32xf32, #tpu.memory_space<vmem>>, vector<16x32xf32>,
    return
  }
}

</mosaic_0001>

<bundles_post_ra>
// kernel: enc_conv_block.1
= control target key start
LH: loop header
LB: loop body
LE: loop exit
PB: predicated region body
PF: predicated region fallthrough
CT: control target
= control target key end

     0   :  { %v24_v0 = vlaneseq  ;;  %vm66_vm0 = vcmask 392192   ;;  %s675_s18 = smov 127   ;;  %vm164_vm5 = vcmask 261120   ;;  %v677_v39 = vmov 0   ;;  %s679_s29 = smov 1   ;;  %s860_s0 = inlined_call_operand.vmem [shape: f32[16,34], index: 0, kind: input, shape index: {}]   ;;  %s861_s1 = inlined_call_operand.vmem [shape: f32[48,96], index: 1, kind: input, shape index: {}]   ;;  %s862_s2 = inlined_call_operand.vmem [shape: f32[32,3], index: 2, kind: input, shape index: {}]   ;;  %s863_s3 = inlined_call_operand.vmem [shape: f32[16,32], index: 3, kind: output, shape index: {}]  }
   0x1   :  { %v705_v1 = vld [vmem:[%s860_s0] sm:$0xff]  ;;  %v710_v2 = vld [vmem:[%s860_s0 + $0x8] sm:$0xff]  ;;  %s676_s0 = smov 126   ;;  %v16_v21 = vld [vmem:[%s861_s1 + $0x10] sm:$0xff]  ;;  %641 = vset.pattern.permute.xlu1 %v677_v39  ;;  %v678_v56 = vmov 1   ;;  %vm305_vm6 = vcmask 277504  }
   0x2   :  { %v14_v3 = vld [vmem:[%s861_s1] sm:$0xff]  ;;  %v631_v4 = vpack.i.bf16 %v710_v2, %v705_v1  ;;  %v25_v5 = vand.u32 127, %v24_v0  ;;  %v576_v8 = vpack.c.bf16 %v710_v2, %v705_v1  ;;  %v15_v20 = vld [vmem:[%s861_s1 + $0x8] sm:$0xff]  ;;  %v17_v22 = vld [vmem:[%s861_s1 + $0x18] sm:$0xff]  ;;  %643 = vset.pattern.permute.xlu0 %v678_v56  ;;  %vm326_vm11 = vcmask 269320  }
   0x3   :  { %543 = vmatprep.mubr.msk.f32.mxu0 %vm66_vm0, %v14_v3  ;;  %v782_v59 = vld [vmem:[%s862_s2] sm:$0xff]  ;;  %v787_v3 = vld [vmem:[%s862_s2 + $0x8] sm:$0xff]  ;;  %vm381_vm12 = vcmask 785408  }
   0x4   :  { %632 = vrot.lane.b32.xlu0 %v631_v4, %s675_s18  ;;  %v30_v6 = vand.u32 15, %v25_v5 }
   0x6   :  { %v40_v7 = vadd.s32 4294967295, %v30_v6  ;;  %v46_v10 = vadd.s32 1, %v30_v6 }
   0x8   :  { %637 = vrot.lane.b32.xlu0 %v631_v4, %s676_s0  ;;  %vm41_vm1 = vcmp.ge.s32.totalorder %v40_v7, 0  ;;  %vm48_vm3 = vcmp.le.s32.totalorder %v46_v10, 15 }
   0x9   :  { %vm722_vm2 = vmpackc.low %vm41_vm1, %vm41_vm1 }
   0xa   :  { %578 = vmatprep.subr.msk.bf16.mxu0 %vm722_vm2, %v576_v8  ;;  %vm730_vm4 = vmpackc.low %vm48_vm3, %vm48_vm3 }
   0xb   :  { %581 = vmatpush3.bf16.msk.msra.mxu0 %vm722_vm2, %v576_v8 }
  0x76   :  { %v633_v11 = vpop.permute.xlu0 %632 }
  0x77   :  { %v635_v12 = vunpack.i.h.bf16 %v633_v11  ;;  %v634_v13 = vunpack.i.l.bf16 %v633_v11 }
  0x79   :  { %v582_v14 = vpack.c.bf16 %v635_v12, %v634_v13 }
  0x7a   :  { %v638_v15 = vpop.permute.xlu0 %637 }
  0x7b   :  { %v640_v16 = vunpack.i.h.bf16 %v638_v15  ;;  %v639_v17 = vunpack.i.l.bf16 %v638_v15  ;;  %583 = vmatprep.subr.bf16.mxu0 %v582_v14 }
  0x7c   :  { %585 = vmatpush3.bf16.msra.mxu0 %v582_v14 }
  0x7d   :  { %v586_v19 = vpack.c.bf16 %v640_v16, %v639_v17  ;;  %v22_v16 = vld [vmem:[%s862_s2 + $0x10] sm:$0xff] }
  0x7f   :  { %588 = vmatprep.subr.msk.bf16.mxu0 %vm730_vm4, %v586_v19 }
  0x80   :  { %591 = vmatpush3.bf16.msk.msra.mxu0 %vm730_vm4, %v586_v19 }
  0x83   :  { %544 = vmatmul.mubr.msk.f32.vlgmr.msra.gmra.mrb[0].mxu0 %vm66_vm0, %v15_v20  ;;  %v23_v20 = vld [vmem:[%s862_s2 + $0x18] sm:$0xff] }
  0x84   :  { %546 = vmatprep.mubr.msk.f32.mxu0 %vm66_vm0, %v16_v21 }
  0x87   :  { %547 = vmatmul.mubr.msk.f32.gmra.mrb[2].mxu0 %vm66_vm0, %v17_v22 }
 0x156   :  { %v750_v23 = vpop.f32.mrb[0].mxu0 }
 0x157   :  { %v752_v24 = vpop.f32.mrb[1].mxu0  ;;  %v168_v25 = vsel %vm164_vm5, %v750_v23, 0.0  ;;  %v182_v30 = vmul.f32 %v750_v23, %v750_v23 }
 0x158   :  { %169 = vadd.xlane.f32.xlu1 %v168_v25  ;;  %v181_v26 = vmul.f32 %v752_v24, %v752_v24  ;;  %v165_v29 = vsel %vm164_vm5, %v752_v24, 0.0 }
 0x159   :  { %v188_v32 = vsel %vm164_vm5, %v182_v30, 0.0 }
 0x15a   :  { %v185_v27 = vsel %vm164_vm5, %v181_v26, 0.0  ;;  %v759_v28 = vpop.f32.mrb[2].mxu0 }
 0x15b   :  { %186 = vadd.xlane.f32.xlu0 %v185_v27  ;;  %v765_v31 = vpop.f32.mrb[3].mxu0  ;;  %v174_v33 = vsel %vm164_vm5, %v759_v28, 0.0  ;;  %v184_v37 = vmul.f32 %v759_v28, %v759_v28 }
 0x15c   :  { %166 = vadd.xlane.f32.xlu1 %v165_v29  ;;  %v183_v34 = vmul.f32 %v765_v31, %v765_v31  ;;  %v171_v35 = vsel %vm164_vm5, %v765_v31, 0.0 }
 0x15d   :  { %v194_v38 = vsel %vm164_vm5, %v184_v37, 0.0  ;;  %v680_v37 = vmov 0.0  }
 0x15e   :  { %v191_v36 = vsel %vm164_vm5, %v183_v34, 0.0  ;;  %306 = vst.msk [vmem:[#allocation2] sm:$0xff] %vm305_vm6, %v680_v37  ;;  %307 = vst.msk [vmem:[#allocation2 + $0x8] sm:$0xff] %vm305_vm6, %v680_v37 }
 0x15f   :  { %308 = vst.msk [vmem:[#allocation2 + $0x10] sm:$0xff] %vm305_vm6, %v680_v37  ;;  %309 = vst.msk [vmem:[#allocation2 + $0x18] sm:$0xff] %vm305_vm6, %v680_v37 }
 0x160   :  { %189 = vadd.xlane.f32.xlu1 %v188_v32 }
 0x164   :  { %175 = vadd.xlane.f32.xlu1 %v174_v33 }
 0x168   :  { %172 = vadd.xlane.f32.xlu1 %v171_v35 }
 0x16c   :  { %192 = vadd.xlane.f32.xlu1 %v191_v36 }
 0x170   :  { %195 = vadd.xlane.f32.xlu1 %v194_v38 }
 0x1e5   :  { %v170_v40 = vpop.xlane.xlu1 %169 }
 0x1e6   :  { %v178_v43 = vmul.f32 0.03125, %v170_v40 }
 0x1e8   :  { %v187_v41 = vpop.xlane.xlu0 %186  ;;  %v202_v48 = vmul.f32 %v178_v43, %v178_v43 }
 0x1e9   :  { %v167_v42 = vpop.xlane.xlu1 %166  ;;  %v197_v45 = vmul.f32 0.03125, %v187_v41 }
 0x1ea   :  { %v177_v44 = vmul.f32 0.03125, %v167_v42 }
 0x1ec   :  { %v201_v46 = vmul.f32 %v177_v44, %v177_v44 }
 0x1ed   :  { %v190_v47 = vpop.xlane.xlu1 %189 }
 0x1ee   :  { %v205_v49 = vsub.f32 %v197_v45, %v201_v46  ;;  %v198_v50 = vmul.f32 0.03125, %v190_v47 }
 0x1f0   :  { %v209_v51 = vadd.f32 1e-05, %v205_v49  ;;  %v206_v52 = vsub.f32 %v198_v50, %v202_v48 }
 0x1f1   :  { %v176_v53 = vpop.xlane.xlu1 %175 }
 0x1f2   :  { %667 = vrsqrt.f32 %v209_v51  ;;  %v210_v54 = vadd.f32 1e-05, %v206_v52  ;;  %v180_v60 = vmul.f32 0.03125, %v176_v53 }
 0x1f4   :  { %669 = vrsqrt.f32 %v210_v54  ;;  %v204_v7 = vmul.f32 %v180_v60, %v180_v60 }
 0x1f5   :  { %v173_v55 = vpop.xlane.xlu1 %172 }
 0x1f6   :  { %v179_v57 = vmul.f32 0.03125, %v173_v55 }
 0x1f8   :  { %v203_v61 = vmul.f32 %v179_v57, %v179_v57 }
 0x1f9   :  { %v193_v58 = vpop.xlane.xlu1 %192 }
 0x1fa   :  { %v199_v62 = vmul.f32 0.03125, %v193_v58 }
 0x1fc   :  { %v668_v63 = vpop.eup %667  ;;  %v207_v0 = vsub.f32 %v199_v62, %v203_v61 }
 0x1fd   :  { %v217_v4 = vmul.f32 %v668_v63, %v782_v59  ;;  %v196_v5 = vpop.xlane.xlu1 %195 }
 0x1fe   :  { %v670_v6 = vpop.eup %669  ;;  %v211_v8 = vadd.f32 1e-05, %v207_v0  ;;  %v200_v10 = vmul.f32 0.03125, %v196_v5 }
 0x1ff   :  { %v221_v11 = vmul.f32 %v217_v4, %v177_v44  ;;  %v218_v12 = vmul.f32 %v670_v6, %v787_v3 }
 0x200   :  { %671 = vrsqrt.f32 %v211_v8  ;;  %v208_v13 = vsub.f32 %v200_v10, %v204_v7 }
 0x201   :  { %229 = vrot.lane.b32.xlu1 %v221_v11, %s679_s29  ;;  %v222_v14 = vmul.f32 %v218_v12, %v178_v43  ;;  %v18_v11 = vld [vmem:[%s861_s1 + $0x20] sm:$0xff] }
 0x202   :  { %v212_v15 = vadd.f32 1e-05, %v208_v13  ;;  %573 = vmatprep.mubr.msk.f32.mxu1 %vm381_vm12, %v18_v11 }
 0x203   :  { %231 = vrot.lane.b32.xlu0 %v222_v14, %s679_s29 }
 0x204   :  { %673 = vrsqrt.f32 %v212_v15 }
 0x20a   :  { %v672_v17 = vpop.eup %671 }
 0x20b   :  { %v219_v19 = vmul.f32 %v672_v17, %v22_v16 }
 0x20d   :  { %v223_v21 = vmul.f32 %v219_v19, %v179_v57 }
 0x20e   :  { %v674_v22 = vpop.eup %673 }
 0x20f   :  { %233 = vrot.lane.b32.xlu1 %v223_v21, %s679_s29  ;;  %v220_v25 = vmul.f32 %v674_v22, %v23_v20 }
 0x211   :  { %v224_v26 = vmul.f32 %v220_v25, %v180_v60 }
 0x213   :  { %235 = vrot.lane.b32.xlu1 %v224_v26, %s679_s29 }
 0x217   :  { %247 = vperm.xlu1 %641, %v217_v4  }
 0x21b   :  { %252 = vperm.xlu1 %641, %v218_v12   ;;  %v681_v12 = vmov 2  }
 0x21f   :  { %257 = vperm.xlu1 %641, %v219_v19  }
 0x223   :  { %642 = vset.pattern.permute.xlu1 %v678_v56 }
 0x273   :  { %v230_v27 = vpop.permute.xlu1 %229 }
 0x274   :  { %v241_v29 = vsub.f32 %v782_v59, %v230_v27 }
 0x275   :  { %v232_v30 = vpop.permute.xlu0 %231 }
 0x276   :  { %v242_v32 = vsub.f32 %v787_v3, %v232_v30  ;;  %271 = vperm.xlu0 %643, %v241_v29  }
 0x278   :  { %276 = vperm.xlu1 %642, %v242_v32  }
 0x27a   :  { %644 = vset.pattern.permute.xlu0 %v677_v39 }
 0x27b   :  { %262 = vperm.xlu0 %644, %v220_v25  }
 0x27f   :  { %665 = vset.pattern.permute.xlu0 %v681_v12 }
 0x281   :  { %v234_v33 = vpop.permute.xlu1 %233 }
 0x282   :  { %v243_v34 = vsub.f32 %v22_v16, %v234_v33 }
 0x284   :  { %281 = vperm.xlu1 %642, %v243_v34  }
 0x285   :  { %v236_v35 = vpop.permute.xlu1 %235 }
 0x286   :  { %v244_v36 = vsub.f32 %v23_v20, %v236_v35 }
 0x288   :  { %286 = vperm.xlu1 %642, %v244_v36  }
 0x28c   :  { %666 = vset.pattern.permute.xlu1 %v681_v12 }
 0x296   :  { %v248_v38 = vpop.permute.xlu1 %247 }
 0x297   :  { %v265_v42 = vmul.f32 %v248_v38, %v752_v24 }
 0x29a   :  { %v253_v40 = vpop.permute.xlu1 %252 }
 0x29b   :  { %v266_v39 = vmul.f32 %v750_v23, %v253_v40 }
 0x29e   :  { %v258_v41 = vpop.permute.xlu1 %257 }
 0x29f   :  { %v267_v51 = vmul.f32 %v258_v41, %v765_v31 }
 0x2f5   :  { %v272_v43 = vpop.permute.xlu0 %271 }
 0x2f6   :  { %v289_v44 = vadd.f32 %v272_v43, %v265_v42 }
 0x2f7   :  { %v277_v45 = vpop.permute.xlu1 %276 }
 0x2f8   :  { %v297_v46 = vmul.f32 0.01, %v289_v44  ;;  %v290_v47 = vadd.f32 %v277_v45, %v266_v39  ;;  %vm293_vm7 = vcmp.ge.f32.partialorder %v289_v44, 0.0 }
 0x2fa   :  { %v298_v48 = vmul.f32 0.01, %v290_v47  ;;  %v301_v49 = vsel %vm293_vm7, %v289_v44, %v297_v46  ;;  %vm294_vm8 = vcmp.ge.f32.partialorder %v290_v47, 0.0  ;;  %v263_v52 = vpop.permute.xlu0 %262 }
 0x2fb   :  { %314 = vrot.lane.b32.xlu0 %v301_v49, %s679_s29  ;;  %v268_v23 = vmul.f32 %v759_v28, %v263_v52 }
 0x2fc   :  { %v302_v50 = vsel %vm294_vm8, %v290_v47, %v298_v48 }
 0x2fd   :  { %316 = vrot.lane.b32.xlu1 %v302_v50, %s679_s29 }
 0x303   :  { %v282_v24 = vpop.permute.xlu1 %281 }
 0x304   :  { %v291_v53 = vadd.f32 %v282_v24, %v267_v51 }
 0x306   :  { %v299_v54 = vmul.f32 0.01, %v291_v53  ;;  %vm295_vm9 = vcmp.ge.f32.partialorder %v291_v53, 0.0 }
 0x307   :  { %v287_v55 = vpop.permute.xlu1 %286 }
 0x308   :  { %v292_v56 = vadd.f32 %v287_v55, %v268_v23  ;;  %v303_v57 = vsel %vm295_vm9, %v291_v53, %v299_v54 }
 0x309   :  { %318 = vrot.lane.b32.xlu0 %v303_v57, %s679_s29 }
 0x30a   :  { %v300_v58 = vmul.f32 0.01, %v292_v56  ;;  %vm296_vm10 = vcmp.ge.f32.partialorder %v292_v56, 0.0 }
 0x30c   :  { %v304_v60 = vsel %vm296_vm10, %v292_v56, %v300_v58 }
 0x30d   :  { %320 = vrot.lane.b32.xlu1 %v304_v60, %s679_s29 }
 0x36d   :  { %v315_v61 = vpop.permute.xlu0 %314 }
 0x36e   :  { %327 = vst.msk [vmem:[#allocation2] sm:$0xff] %vm326_vm11, %v315_v61 }
 0x36f   :  { %v317_v31 = vpop.permute.xlu1 %316 }
 0x370   :  { %328 = vst.msk [vmem:[#allocation2 + $0x8] sm:$0xff] %vm326_vm11, %v317_v31 }
 0x375   :  { %v331_v28 = vld [vmem:[#allocation2] sm:$0xff] }
 0x377   :  { %v332_v62 = vld [vmem:[#allocation2 + $0x8] sm:$0xff] }
 0x378   :  { %v645_v63 = vpack.i.bf16 %v332_v62, %v331_v28  ;;  %v592_v0 = vpack.c.bf16 %v332_v62, %v331_v28 }
 0x37a   :  { %646 = vrot.lane.b32.xlu0 %v645_v63, %s675_s18  ;;  %594 = vmatprep.subr.msk.bf16.mxu1 %vm722_vm2, %v592_v0 }
 0x37b   :  { %v319_v4 = vpop.permute.xlu0 %318  ;;  %597 = vmatpush3.bf16.msk.msra.mxu1 %vm722_vm2, %v592_v0 }
 0x37c   :  { %329 = vst.msk [vmem:[#allocation2 + $0x10] sm:$0xff] %vm326_vm11, %v319_v4 }
 0x37e   :  { %656 = vrot.lane.b32.xlu0 %v645_v63, %s676_s0 }
 0x37f   :  { %v321_v5 = vpop.permute.xlu1 %320 }
 0x380   :  { %330 = vst.msk [vmem:[#allocation2 + $0x18] sm:$0xff] %vm326_vm11, %v321_v5 }
 0x382   :  { %373 = vperm.xlu0 %665, %v782_v59  }
 0x383   :  { %v333_v6 = vld [vmem:[#allocation2 + $0x10] sm:$0xff] }
 0x387   :  { %v334_v7 = vld [vmem:[#allocation2 + $0x18] sm:$0xff] }
 0x388   :  { %v650_v8 = vpack.i.bf16 %v334_v7, %v333_v6  ;;  %v598_v10 = vpack.c.bf16 %v334_v7, %v333_v6 }
 0x38a   :  { %651 = vrot.lane.b32.xlu1 %v650_v8, %s675_s18  ;;  %600 = vmatprep.subr.msk.bf16.mxu1 %vm722_vm2, %v598_v10 }
 0x38b   :  { %603 = vmatpush3.bf16.msk.msra.mxu1 %vm722_vm2, %v598_v10 }
 0x38e   :  { %661 = vrot.lane.b32.xlu1 %v650_v8, %s676_s0 }
 0x392   :  { %378 = vperm.xlu1 %666, %v787_v3   ;;  %v19_v3 = vld [vmem:[%s861_s1 + $0x28] sm:$0xff] }
 0x3ec   :  { %v647_v13 = vpop.permute.xlu0 %646 }
 0x3ed   :  { %v649_v14 = vunpack.i.h.bf16 %v647_v13  ;;  %v648_v15 = vunpack.i.l.bf16 %v647_v13 }
 0x3ef   :  { %v604_v16 = vpack.c.bf16 %v649_v14, %v648_v15 }
 0x3f0   :  { %v657_v17 = vpop.permute.xlu0 %656 }
 0x3f1   :  { %605 = vmatprep.subr.bf16.mxu1 %v604_v16  ;;  %v659_v19 = vunpack.i.h.bf16 %v657_v17  ;;  %v658_v20 = vunpack.i.l.bf16 %v657_v17 }
 0x3f2   :  { %607 = vmatpush3.bf16.msra.mxu1 %v604_v16 }
 0x3f3   :  { %v612_v27 = vpack.c.bf16 %v659_v19, %v658_v20 }
 0x3fc   :  { %v652_v9 = vpop.permute.xlu1 %651 }
 0x3fd   :  { %v654_v21 = vunpack.i.h.bf16 %v652_v9  ;;  %v653_v22 = vunpack.i.l.bf16 %v652_v9 }
 0x3ff   :  { %v608_v25 = vpack.c.bf16 %v654_v21, %v653_v22 }
 0x400   :  { %v662_v26 = vpop.permute.xlu1 %661 }
 0x401   :  { %v664_v29 = vunpack.i.h.bf16 %v662_v26  ;;  %v663_v30 = vunpack.i.l.bf16 %v662_v26  ;;  %609 = vmatprep.subr.bf16.mxu1 %v608_v25  ;;  %v374_v33 = vpop.permute.xlu0 %373 }
 0x402   :  { %611 = vmatpush3.bf16.msra.mxu1 %v608_v25 }
 0x403   :  { %614 = vmatprep.subr.msk.bf16.mxu1 %vm730_vm4, %v612_v27  ;;  %v618_v59 = vpack.c.bf16 %v664_v29, %v663_v30 }
 0x406   :  { %617 = vmatpush3.bf16.msk.msra.mxu1 %vm730_vm4, %v612_v27 }
 0x407   :  { %620 = vmatprep.subr.msk.bf16.mxu1 %vm730_vm4, %v618_v59 }
 0x40a   :  { %623 = vmatpush3.bf16.msk.msra.mxu1 %vm730_vm4, %v618_v59 }
 0x40d   :  { %574 = vmatmul.mubr.msk.f32.vlgmr.msra.gmra.mrb[0].mxu1 %vm381_vm12, %v19_v3 }
 0x411   :  { %v379_v32 = vpop.permute.xlu1 %378 }
 0x4e0   :  { %v575_v34 = vpop.f32.mrb[0].mxu1 }
 0x4e1   :  { %v460_v35 = vadd.f32 %v575_v34, %v379_v32  ;;  %v454_v36 = vpop.f32.mrb[1].mxu1 }
 0x4e2   :  { %v455_v37 = vadd.f32 %v454_v36, %v374_v33 }
 0x4e3   :  { %469 = vrot.lane.b32.xlu0 %v460_v35, %s679_s29 }
 0x4e4   :  { %467 = vrot.lane.b32.xlu1 %v455_v37, %s679_s29 }
 0x555   :  { %v470_v38 = vpop.permute.xlu0 %469 }
 0x556   :  { %v474_v18 = vadd.f32 %v470_v38, %v710_v2  ;;  %v468_v40 = vpop.permute.xlu1 %467 }
 0x557   :  { %v473_v41 = vadd.f32 %v468_v40, %v705_v1 }
 0x558   :  { %479 = vrot.lane.b32.xlu0 %v474_v18, %s675_s18 }
 0x559   :  { %477 = vrot.lane.b32.xlu1 %v473_v41, %s675_s18 }
 0x5ca   :  { %v480_v42 = vpop.permute.xlu0 %479 }
 0x5cb   :  { %484 = vst.msk [vmem:[%s863_s3 + $0x8] sm:$0xff] %vm164_vm5, %v480_v42  ;;  %v478_v43 = vpop.permute.xlu1 %477 }
 0x5cc   :  { %483 = vst.msk [vmem:[%s863_s3] sm:$0xff] %vm164_vm5, %v478_v43 }

</bundles_post_ra>
